<compile_context>
chip_gen: v5e
topology: v5e:2x2
jax: 0.10.0
libtpu: 0.0.40
codegen_flags: <defaults>
</compile_context>

<pallas_src>
import functools
import math

import jax
import jax.numpy as jnp
from jax import lax
from jax.experimental import pallas as pl
from jax.experimental.pallas import tpu as pltpu


_INV_SQRT2 = 1.0 / math.sqrt(2.0)


def _round_up(n, m):
    return ((n + m - 1) // m) * m


def _tpu_vmem_bytes():
    try:
        return int(pltpu.get_tpu_info().vmem_capacity_bytes)
    except Exception:
        return 128 * (1 << 20)


def _num_tensorcores():
    try:
        d = jax.devices()[0]
        for attr in ("num_cores", "core_count"):
            v = getattr(d, attr, None)
            if v:
                return max(1, min(2, int(v)))
    except Exception:
        pass
    return 1


def _spec(shape, index_map, *, single_buffer=False):
    """BlockSpec; optionally single-buffered for blocks constant over the grid."""
    if single_buffer:
        try:
            return pl.BlockSpec(shape, index_map, pipeline_mode=pl.Buffered(1))
        except Exception:  # older jax without pipeline_mode / Buffered(1)
            pass
    return pl.BlockSpec(shape, index_map)


def _gelu(h, approximate):
    if approximate:
        # tanh approximation: single EUP push instead of a long erf polynomial.
        return jax.nn.gelu(h, approximate=True)
    # Exact erf-based GELU (matches torch.nn.GELU() default).
    return 0.5 * h * (1.0 + lax.erf(h * _INV_SQRT2))


# --------------------------------------------------------------------------
# Kernels
# --------------------------------------------------------------------------

def _mlp_kernel_resident(x_ref, wfc_ref, bfc_ref, wproj_ref, bproj_ref, o_ref,
                         *, approximate=False):
    # Full weights resident in VMEM: no accumulator, direct output write.
    h = jnp.dot(x_ref[...], wfc_ref[...], preferred_element_type=jnp.float32)
    h = _gelu(h + bfc_ref[...], approximate)
    out = jnp.dot(h.astype(wproj_ref.dtype), wproj_ref[...],
                  preferred_element_type=jnp.float32)
    o_ref[...] = (out + bproj_ref[...]).astype(o_ref.dtype)


def _mlp_kernel_streamed(x_ref, wfc_ref, bfc_ref, wproj_ref, bproj_ref, o_ref,
                         acc_ref, *, approximate=False):
    # Weight slabs stream over the hidden ("arbitrary") reduction axis j.
    j = pl.program_id(1)

    h = jnp.dot(x_ref[...], wfc_ref[...], preferred_element_type=jnp.float32)
    h = _gelu(h + bfc_ref[...], approximate)
    part = jnp.dot(h.astype(wproj_ref.dtype), wproj_ref[...],
                   preferred_element_type=jnp.float32)

    @pl.when(j == 0)
    def _():
        acc_ref[...] = part          # write, not zero-init + add

    @pl.when(j > 0)
    def _():
        acc_ref[...] += part

    @pl.when(j == pl.num_programs(1) - 1)
    def _():
        o_ref[...] = (acc_ref[...] + bproj_ref[...]).astype(o_ref.dtype)


# --------------------------------------------------------------------------
# Tile selection helpers
# --------------------------------------------------------------------------

def _tm_candidates(M, target):
    top = max(8, min(_round_up(target, 8), _round_up(M, 8)))
    fixed = (1024, 768, 512, 384, 256, 192, 128, 96, 64, 48, 32, 16, 8)
    cands = [] if top in fixed else [top]
    cands += [c for c in fixed if c <= top]
    return cands


def _th_candidates(H):
    # Prefer 256-aligned slabs (2x256 MXU on v6e/v7x), fall back to 128.
    for step in (256, 128):
        top = (min(H, 2048) // step) * step
        cands = [t for t in range(top, step - 1, -step) if H % t == 0]
        if cands:
            return cands
    # No aligned divisor <= 2048: keep the full hidden dim.
    return [H]


# --------------------------------------------------------------------------
# Wrapper
# --------------------------------------------------------------------------

def mlp_pallas(x, w_fc, b_fc, w_proj, b_proj, *, tm=None, th=None,
               approximate_gelu=False, vmem_limit_bytes=None):
    """x: (B, T, C); returns (B, T, C).

    For best perf on v5e / v7x pass x and the weights in bf16 (the kernel
    already accumulates in f32 on the MXU).
    """
    B, T, C = x.shape
    Cin, H = w_fc.shape
    assert Cin == C and w_proj.shape == (H, C)
    assert b_fc.shape == (H,) and b_proj.shape == (C,)
    M = B * T
    x2 = x.reshape(M, C)

    it_x = jnp.dtype(x.dtype).itemsize
    it_w = jnp.dtype(w_fc.dtype).itemsize
    it_b = jnp.dtype(b_fc.dtype).itemsize

    # --- generation-aware VMEM budget ---
    phys = _tpu_vmem_bytes()
    if phys <= 64 * (1 << 20):       # v7x-class: 64 MiB/TC, leave headroom
        usable = 48 * (1 << 20)
        resident_thresh = 14 * (1 << 20)
    else:                            # v5e / v6e: 128 MiB physical
        usable = 100 * (1 << 20)
        resident_thresh = 48 * (1 << 20)

    def need_bytes(tm_, th_, resident_):
        wbuf = 1 if resident_ else 2
        return (wbuf * 2 * C * th_ * it_w               # w_fc + w_proj slabs
                + wbuf * th_ * it_b + C * it_b          # biases
                + 2 * tm_ * C * it_x                    # x double buffer
                + 2 * tm_ * C * it_x                    # out double buffer
                + (0 if resident_ else tm_ * C * 4)     # f32 accumulator
                + 2 * tm_ * th_ * 4                     # h + elementwise temp
                + tm_ * C * 4)                          # dot-2 f32 temp

    w_bytes = 2 * C * H * it_w

    # --- pick (th, tm) ---
    if th is not None:
        assert H % th == 0, "th must divide H"
        if tm is None:
            res_sel = th == H
            target = 512 if res_sel else 1024
            tm = next((c for c in _tm_candidates(M, target)
                       if need_bytes(c, th, res_sel) <= usable), 8)
    else:
        th = None
        if w_bytes <= resident_thresh:
            # Try keeping the full weights resident in VMEM.
            if tm is not None:
                if need_bytes(tm, H, True) <= usable:
                    th = H
            else:
                tm_r = next((c for c in _tm_candidates(M, 512)
                             if need_bytes(c, H, True) <= usable), None)
                if tm_r is not None:
                    th, tm = H, tm_r
        if th is None:
            # Stream weight slabs: maximize tm first (weight re-fetch traffic
            # scales with grid_m), then the largest MXU-aligned th that fits.
            tms = ([max(8, _round_up(min(tm, _round_up(M, 8)), 8))]
                   if tm is not None else _tm_candidates(M, 1024))
            picked = None
            for tm_c in tms:
                for th_c in _th_candidates(H):
                    if need_bytes(tm_c, th_c, False) <= usable:
                        picked = (tm_c, th_c)
                        break
                if picked:
                    break
            if picked is None:
                picked = (tms[-1], _th_candidates(H)[-1])
            tm, th = picked

    # --- token tile: multiple of the f32 sublane (8), clamped for tiny M ---
    tm = max(8, _round_up(min(tm, _round_up(M, 8)), 8))

    # --- even grid_m across TensorCores (v7x) ---
    ncores = _num_tensorcores()
    gm = -(-M // tm)
    if ncores > 1 and gm > 1 and gm % ncores:
        gm_bal = _round_up(gm, ncores)
        tm_bal = _round_up(-(-M // gm_bal), 8)
        if tm_bal >= 8:
            tm = tm_bal

    M_pad = _round_up(M, tm)
    if M_pad != M:
        x2 = jnp.pad(x2, ((0, M_pad - M), (0, 0)))
    grid_m = M_pad // tm
    grid_h = H // th
    weights_resident = grid_h == 1

    # --- honest VMEM request: need + fixed headroom, generation-aware cap ---
    need = need_bytes(tm, th, weights_resident)
    if vmem_limit_bytes is None:
        vmem_limit_bytes = max(16 * (1 << 20), min(usable, need + 8 * (1 << 20)))

    b_fc2 = b_fc.reshape(1, H)
    b_proj2 = b_proj.reshape(1, C)

    if weights_resident:
        kernel = functools.partial(_mlp_kernel_resident,
                                   approximate=approximate_gelu)
        grid = (grid_m,)
        in_specs = [
            pl.BlockSpec((tm, C), lambda i: (i, 0)),                       # x
            _spec((C, H), lambda i: (0, 0), single_buffer=True),           # w_fc
            _spec((1, H), lambda i: (0, 0), single_buffer=True),           # b_fc
            _spec((H, C), lambda i: (0, 0), single_buffer=True),           # w_proj
            _spec((1, C), lambda i: (0, 0), single_buffer=True),           # b_proj
        ]
        out_specs = pl.BlockSpec((tm, C), lambda i: (i, 0))
        scratch_shapes = []
        dim_sem = ("parallel",)
    else:
        kernel = functools.partial(_mlp_kernel_streamed,
                                   approximate=approximate_gelu)
        grid = (grid_m, grid_h)
        in_specs = [
            pl.BlockSpec((tm, C), lambda i, j: (i, 0)),                    # x
            pl.BlockSpec((C, th), lambda i, j: (0, j)),                    # w_fc
            pl.BlockSpec((1, th), lambda i, j: (0, j)),                    # b_fc
            pl.BlockSpec((th, C), lambda i, j: (j, 0)),                    # w_proj
            _spec((1, C), lambda i, j: (0, 0), single_buffer=True),        # b_proj
        ]
        out_specs = pl.BlockSpec((tm, C), lambda i, j: (i, 0))
        scratch_shapes = [pltpu.VMEM((tm, C), jnp.float32)]
        dim_sem = ("parallel", "arbitrary")

    out2 = pl.pallas_call(
        kernel,
        out_shape=jax.ShapeDtypeStruct((M_pad, C), x.dtype),
        grid_spec=pltpu.PrefetchScalarGridSpec(
            num_scalar_prefetch=0,
            grid=grid,
            in_specs=in_specs,
            out_specs=out_specs,
            scratch_shapes=scratch_shapes,
        ),
        compiler_params=pltpu.CompilerParams(
            dimension_semantics=dim_sem,
            vmem_limit_bytes=int(vmem_limit_bytes),
        ),
    )(x2, w_fc, b_fc2, w_proj, b_proj2)

    # TODO(synk): for C not a multiple of 128 the output stores are lane-masked;
    # real GPT-2 (C=768) is already lane-dense so no extra pad is done here.
    return out2[:M].reshape(B, T, C)


def _reference_mlp(x, w_fc, b_fc, w_proj, b_proj):
    h = x @ w_fc + b_fc
    h = 0.5 * h * (1.0 + lax.erf(h / jnp.sqrt(2.0).astype(h.dtype)))
    return h @ w_proj + b_proj


if __name__ == "__main__":
    key = jax.random.PRNGKey(0)

    def make_params(k, C, H, dtype=jnp.float32):
        k1, k2, k3, k4 = jax.random.split(k, 4)
        w_fc = jax.random.normal(k1, (C, H), dtype) * (1.0 / math.sqrt(C))
        b_fc = jax.random.normal(k2, (H,), dtype) * 0.01
        w_proj = jax.random.normal(k3, (H, C), dtype) * (1.0 / math.sqrt(H))
        b_proj = jax.random.normal(k4, (C,), dtype) * 0.01
        return w_fc, b_fc, w_proj, b_proj

    # Case 1: resident-weights fast path (config.n_embd = 32 -> hidden = 128).
    # tm=8 keeps the tiny demo multi-step on the token grid (grid_m = 2).
    B, T, C = 2, 8, 32
    kx, kp, key = jax.random.split(key, 3)
    x = jax.random.normal(kx, (B, T, C), dtype=jnp.float32)
    params = make_params(kp, C, 4 * C)
    out = jax.block_until_ready(mlp_pallas(x, *params, tm=8))
    ref = _reference_mlp(x, *params)
    assert out.shape == (B, T, C)
    assert jnp.allclose(out, ref, atol=1e-4, rtol=1e-4), "resident path mismatch"

    # Case 2: streamed-weights path (hidden reduction, grid_h = 2) with the
    # write-then-accumulate f32 accumulator.
    B, T, C = 2, 8, 64
    kx, kp, key = jax.random.split(key, 3)
    x = jax.random.normal(kx, (B, T, C), dtype=jnp.float32)
    params = make_params(kp, C, 4 * C)
    out = jax.block_until_ready(mlp_pallas(x, *params, tm=8, th=128))
    ref = _reference_mlp(x, *params)
    assert out.shape == (B, T, C)
    assert jnp.allclose(out, ref, atol=1e-4, rtol=1e-4), "streamed path mismatch"

    print("KERNEL_OK")
</pallas_src>

<mosaic_0001>
module attributes {stable_mosaic.version = 11 : i64} {
  func.func @_mlp_kernel_resident(%arg0: i32, %arg1: memref<8x32xf32, #tpu.memory_space<vmem>>, %arg2: memref<32x128xf32, #tpu.memory_space<vmem>>, %arg3: memref<1x128xf32, #tpu.memory_space<vmem>>, %arg4: memref<128x32xf32, #tpu.memory_space<vmem>>, %arg5: memref<1x32xf32, #tpu.memory_space<vmem>>, %arg6: memref<8x32xf32, #tpu.memory_space<vmem>>) attributes {dimension_semantics = [#tpu.dimension_semantics<parallel>], iteration_bounds = array<i64: 2>, scalar_prefetch = 0 : i64, scratch_operands = 0 : i64, tpu.core_type = #tpu.core_type<tc>, window_params = [{transform_indices = @transform_0, window_bounds = array<i64: 8, 32>}, {pipeline_mode = #tpu.pipeline_mode<synchronous>, transform_indices = @transform_1, window_bounds = array<i64: 32, 128>}, {pipeline_mode = #tpu.pipeline_mode<synchronous>, transform_indices = @transform_2, window_bounds = array<i64: 1, 128>}, {pipeline_mode = #tpu.pipeline_mode<synchronous>, transform_indices = @transform_3, window_bounds = array<i64: 128, 32>}, {pipeline_mode = #tpu.pipeline_mode<synchronous>, transform_indices = @transform_4, window_bounds = array<i64: 1, 32>}, {transform_indices = @transform_5, window_bounds = array<i64: 8, 32>}]} {
    %c0 = arith.constant 0 : index
    %c0_0 = arith.constant 0 : index
    %0 = vector.load %arg1[%c0, %c0_0] : memref<8x32xf32, #tpu.memory_space<vmem>>, vector<8x32xf32>
    %c0_1 = arith.constant 0 : index
    %c0_2 = arith.constant 0 : index
    %1 = vector.load %arg2[%c0_1, %c0_2] : memref<32x128xf32, #tpu.memory_space<vmem>>, vector<32x128xf32>
    %cst = arith.constant dense<0.000000e+00> : vector<8x128xf32>
    %2 = tpu.matmul %0, %1, %cst {dimension_numbers = #tpu.dot_dimension_numbers<[1], [0], [0], [1], [0, 0, 1, 1], [], []>} : vector<8x32xf32>, vector<32x128xf32>, vector<8x128xf32> -> vector<8x128xf32>
    %c0_3 = arith.constant 0 : index
    %c0_4 = arith.constant 0 : index
    %3 = vector.load %arg3[%c0_3, %c0_4] : memref<1x128xf32, #tpu.memory_space<vmem>>, vector<1x128xf32>
    %4 = vector.broadcast %3 : vector<1x128xf32> to vector<8x128xf32>
    %5 = arith.addf %2, %4 : vector<8x128xf32>
    %cst_5 = arith.constant 5.000000e-01 : f32
    %6 = vector.broadcast %cst_5 : f32 to vector<8x128xf32>
    %7 = arith.mulf %6, %5 : vector<8x128xf32>
    %cst_6 = arith.constant 0.707106769 : f32
    %8 = vector.broadcast %cst_6 : f32 to vector<8x128xf32>
    %9 = arith.mulf %5, %8 : vector<8x128xf32>
    %10 = math.erf %9 : vector<8x128xf32>
    %cst_7 = arith.constant 1.000000e+00 : f32
    %11 = vector.broadcast %cst_7 : f32 to vector<8x128xf32>
    %12 = arith.addf %11, %10 : vector<8x128xf32>
    %13 = arith.mulf %7, %12 : vector<8x128xf32>
    %c0_8 = arith.constant 0 : index
    %c0_9 = arith.constant 0 : index
    %14 = vector.load %arg4[%c0_8, %c0_9] : memref<128x32xf32, #tpu.memory_space<vmem>>, vector<128x32xf32>
    %cst_10 = arith.constant dense<0.000000e+00> : vector<8x32xf32>
    %15 = tpu.matmul %13, %14, %cst_10 {dimension_numbers = #tpu.dot_dimension_numbers<[1], [0], [0], [1], [0, 0, 1, 1], [], []>} : vector<8x128xf32>, vector<128x32xf32>, vector<8x32xf32> -> vector<8x32xf32>
    %c0_11 = arith.constant 0 : index
    %c0_12 = arith.constant 0 : index
    %16 = vector.load %arg5[%c0_11, %c0_12] : memref<1x32xf32, #tpu.memory_space<vmem>>, vector<1x32xf32>
    %17 = vector.broadcast %16 : vector<1x32xf32> to vector<8x32xf32>
    %18 = arith.addf %15, %17 : vector<8x32xf32>
    %c0_13 = arith.constant 0 : index
    %c0_14 = arith.constant 0 : index
    %19 = vector.load %arg6[%c0_13, %c0_14] : memref<8x32xf32, #tpu.memory_space<vmem>>, vector<8x32xf32>
    tpu.vector_store %arg6[%c0_13, %c0_14], %18 {strides = array<i32>} : memref<8x32xf32, #tpu.memory_space<vmem>>, vector<8x32xf32>,
    return
  }
  func.func @transform_0(%arg0: i32) -> (i32, i32) {
    %c0_i32 = arith.constant 0 : i32
    %c0_i32_0 = arith.constant 0 : i32
    return %arg0, %c0_i32 : i32, i32
  }
  func.func @transform_1(%arg0: i32) -> (i32, i32) {
    %c0_i32 = arith.constant 0 : i32
    %c0_i32_0 = arith.constant 0 : i32
    %c0_i32_1 = arith.constant 0 : i32
    return %c0_i32, %c0_i32_0 : i32, i32
  }
  func.func @transform_2(%arg0: i32) -> (i32, i32) {
    %c0_i32 = arith.constant 0 : i32
    %c0_i32_0 = arith.constant 0 : i32
    %c0_i32_1 = arith.constant 0 : i32
    return %c0_i32, %c0_i32_0 : i32, i32
  }
  func.func @transform_3(%arg0: i32) -> (i32, i32) {
    %c0_i32 = arith.constant 0 : i32
    %c0_i32_0 = arith.constant 0 : i32
    %c0_i32_1 = arith.constant 0 : i32
    return %c0_i32, %c0_i32_0 : i32, i32
  }
  func.func @transform_4(%arg0: i32) -> (i32, i32) {
    %c0_i32 = arith.constant 0 : i32
    %c0_i32_0 = arith.constant 0 : i32
    %c0_i32_1 = arith.constant 0 : i32
    return %c0_i32, %c0_i32_0 : i32, i32
  }
  func.func @transform_5(%arg0: i32) -> (i32, i32) {
    %c0_i32 = arith.constant 0 : i32
    %c0_i32_0 = arith.constant 0 : i32
    return %arg0, %c0_i32 : i32, i32
  }
}

</mosaic_0001>

<bundles_post_ra>
// kernel: tpu_custom_call.1
= control target key start
LH: loop header
LB: loop body
LE: loop exit
PB: predicated region body
PF: predicated region fallthrough
CT: control target
= control target key end

     0   :  { %10 = vsyncpa [#allocation3], 0  ;;  %s715_s0 = inlined_call_operand.vmem [shape: f32[16,32], index: 0, kind: input, shape index: {}]   ;;  %s716_s1 = inlined_call_operand.vmem [shape: f32[32,128], index: 1, kind: input, shape index: {}]   ;;  %s717_s2 = inlined_call_operand.vmem [shape: f32[1,128], index: 2, kind: input, shape index: {}]   ;;  %s718_s3 = inlined_call_operand.vmem [shape: f32[128,32], index: 3, kind: input, shape index: {}]   ;;  %s719_s4 = inlined_call_operand.vmem [shape: f32[1,32], index: 4, kind: input, shape index: {}]   ;;  %s720_s5 = inlined_call_operand.hbm [shape: f32[16,32], index: 5, kind: output, shape index: {}]  }
   0x1   :  { %12 = vsyncpa [#allocation3 + $0x1], 0  ;;  %s562_s18 = smov 0   ;;  %s564_s19 = smov 0  }
   0x2   :  { %s566_s20 = smov 0   ;;  %s568_s21 = smov 0  }
   0x3 LB: > { %s583_s22 = sadd.s32 4294967295, %s530_s21   ;;  %s413_s23 = sadd.s32 4294967294, %s530_s21   ;;  %s530_s21 = sphi %s568_s21, %s726_s21   ;;  %s526_s20 = sphi %s566_s20, %s725_s20   ;;  %s522_s19 = sphi %s564_s19, %s724_s19   ;;  %s518_s18 = sphi %s562_s18, %s723_s18  }
   0x4   : > { %s587_s24 = sadd.s32 1, %s530_s21   ;;  %s135_s25 = sadd.s32 1, %s526_s20 }
   0x5   : > { %s132_s26 = ssub.s32 %s530_s21, %s587_s24  ;;  %p145_p0 = scmp.ne.s32.totalorder %s526_s20, %s522_s19 }
   0x6   : > { %p133_p1 = scmp.eq.s32.totalorder %s132_s26, 0  ;;  %p146_p2 = scmp.eq.s32.totalorder %s583_s22, 1 }
   0x7   : > { %p151_p3 = scmp.ne.s32.totalorder %s522_s19, %s518_s18  ;;  %p152_p4 = scmp.eq.s32.totalorder %s413_s23, 1 }
   0x8   : > { %s598_s27 = scalar_select %p133_p1, %s526_s20, %s135_s25  }
   0x9   : > { %p600_p5 = por %p146_p2, %p145_p0  ;;  %p604_p6 = por %p152_p4, %p151_p3 }
   0xa   : > { %p416_p7 = scmp.ge.s32.totalorder %s530_s21, 1  ;;  %p189_p8 = scmp.lt.s32.totalorder %s530_s21, 3 }
   0xc   : > { %p190_p9 = pnand %p416_p7, %p189_p8 }
   0xd   : > { %p216_p10 = scmp.lt.s32.totalorder (!%p190_p9), %s583_s22, 1  ;;  %s213_s26 = sand.u32 (!%p190_p9), 1, %s522_s19  }
   0xe   : > { %193 = sbr.rel (%p190_p9) target bundleno = 337 (0x151), region = 40  ;;  %s417_s30 = sshll.u32 (!%p190_p9), %s213_s26, 3 }
   0xf   : > { %s422_s6 = sshll.u32 (!%p190_p9), %s583_s22, 3  ;;  %s215_s12 = scalar_lea.vmem (!%p190_p9), [#allocation2], %s417_s30 }
  0x10   : > { %s349_s9 = scalar_lea.hbm (!%p190_p9), %s720_s5, %s422_s6  ;;  %s351_s13 = sshll.u32 (!%p190_p9), %s215_s12, 4  ;;  %s352_s13 = int_to_ptr.vmem [resolvable:$true] %s351_s13 }
  0x11   : > { %s339_s15 = scalar_lea.sflag (!%p190_p9), [#allocation3], %s213_s26  ;;  %s488_s25 = scalar_lea.hbm (!%p190_p9), %s720_s5, 16 }
  0x13   : > { %v224_v0 = vld [vmem:[%s716_s1 + $0x18] sm:$0xff]  ;;  %v223_v1 = vld [vmem:[%s716_s1 + $0x10] sm:$0xff]  ;;  %v222_v2 = vld [vmem:[%s716_s1 + $0x8] sm:$0xff]  ;;  %s217_s11 = scalar_select %p216_p10, %s583_s22, 1  ;;  %vm229_vm0 = vcmask 261120  }
  0x14   : > { %245 = vmatpush.msra.mxu0 %v224_v0  ;;  %v221_v3 = vld [vmem:[%s716_s1] sm:$0xff]  ;;  %v312_v5 = vld [vmem:[%s718_s3 + $0x78] sm:$0xff]  ;;  %v311_v6 = vld [vmem:[%s718_s3 + $0x70] sm:$0xff] }
  0x15   : > { %s418_s14 = sshll.u32 %s217_s11, 3  ;;  %317 = vmatpush.msra.mxu1 %v312_v5  ;;  %v310_v7 = vld [vmem:[%s718_s3 + $0x68] sm:$0xff]  ;;  %v309_v8 = vld [vmem:[%s718_s3 + $0x60] sm:$0xff]  ;;  %v308_v10 = vld [vmem:[%s718_s3 + $0x58] sm:$0xff] }
  0x16   : > { %246 = vmatpush.msra.mxu0 %v223_v1  ;;  %s219_s17 = scalar_lea.vmem %s715_s0, %s418_s14  ;;  %v464_v9 = vld [vmem:[%s717_s2] ss:$0 sm:$0xff]  ;;  %v307_v11 = vld [vmem:[%s718_s3 + $0x50] sm:$0xff]  ;;  %v306_v13 = vld [vmem:[%s718_s3 + $0x48] sm:$0xff]  ;;  %s353_s14 = sshll.u32 %s349_s9, 4  ;;  %s354_s14 = int_to_ptr.hbm [resolvable:$true] %s353_s14 }
  0x17   : > { %v220_v4 = vld [vmem:[%s219_s17] sm:$0xff]  ;;  %318 = vmatpush.msra.mxu1 %v311_v6  ;;  %v304_v17 = vld [vmem:[%s718_s3 + $0x38] sm:$0xff]  ;;  %v303_v19 = vld [vmem:[%s718_s3 + $0x30] sm:$0xff]  ;;  %s482_s22 = sshra.s32 %s354_s14, 4  ;;  %s483_s22 = int_to_ptr.hbm [resolvable:$true] %s482_s22 }
  0x18   : > { %247 = vmatpush.msra.mxu0 %v222_v2  ;;  %v305_v15 = vld [vmem:[%s718_s3 + $0x40] sm:$0xff]  ;;  %v302_v21 = vld [vmem:[%s718_s3 + $0x28] sm:$0xff]  ;;  %v300_v27 = vld [vmem:[%s718_s3 + $0x18] sm:$0xff]  ;;  %s484_s16 = scalar_lea.hbm %s483_s22, 8  ;;  %p489_p0 = scmp.lt.s32.totalorder %s483_s22, %s720_s5 }
  0x19   : > { %319 = vmatpush.msra.mxu1 %v310_v7  ;;  %v301_v24 = vld [vmem:[%s718_s3 + $0x20] sm:$0xff]  ;;  %v299_v30 = vld [vmem:[%s718_s3 + $0x10] sm:$0xff]  ;;  %v298_v33 = vld [vmem:[%s718_s3 + $0x8] sm:$0xff]  ;;  %p485_p11 = scmp.ne.s32.totalorder %s483_s22, %s484_s16  ;;  %p490_p1 = scmp.lt.s32.totalorder %s488_s25, %s484_s16 }
  0x1a   : > { %248 = vmatpush.msra.mxu0 %v221_v3  ;;  %v297_v35 = vld [vmem:[%s718_s3] sm:$0xff] }
  0x1b   : > { %419 = vmatmul.msk.f32.vlgmr.msra.gmra.mxu0 %vm229_vm0, %v220_v4  ;;  %320 = vmatpush.msra.mxu1 %v309_v8  ;;  %v465_v63 = vld [vmem:[%s719_s4] ss:$0 sm:$0xff]  ;;  %p486_p12 = pnand %p485_p11, %p600_p5  ;;  %p491_p2 = por %p490_p1, %p489_p0 }
  0x1d   : > { %321 = vmatpush.msra.mxu1 %v308_v10  ;;  %p487_p13 = pneg %p486_p12 }
  0x1f   : > { %322 = vmatpush.msra.mxu1 %v307_v11  ;;  %p492_p3 = pnand %p491_p2, %p487_p13 }
  0x21   : > { %323 = vmatpush.msra.mxu1 %v306_v13 }
  0x23   : > { %324 = vmatpush.msra.mxu1 %v305_v15 }
  0x25   : > { %325 = vmatpush.msra.mxu1 %v304_v17 }
  0x27   : > { %326 = vmatpush.msra.mxu1 %v303_v19 }
  0x29   : > { %327 = vmatpush.msra.mxu1 %v302_v21 }
  0x2b   : > { %328 = vmatpush.msra.mxu1 %v301_v24 }
  0x2d   : > { %329 = vmatpush.msra.mxu1 %v300_v27 }
  0x2f   : > { %330 = vmatpush.msra.mxu1 %v299_v30 }
  0x31   : > { %331 = vmatpush.msra.mxu1 %v298_v33 }
  0x33   : > { %332 = vmatpush.msra.mxu1 %v297_v35 }
  0x98   : > { %v250_v12 = vpop.f32.mrf.mxu0 }
  0x99   : > { %v251_v14 = vadd.f32 %v464_v9, %v250_v12 }
  0x9b   : > { %v254_v16 = vmul.f32 0.70710677, %v251_v14  ;;  %v253_v60 = vmul.f32 0.5, %v251_v14 }
  0x9d   : > { %v255_v18 = vmul.f32 %v254_v16, %v254_v16 }
  0x9f   : > { %v256_v20 = vmin.f32 %v255_v18, 16.0 }
  0xa1   : > { %v257_v22 = vmul.f32 2.1237322e-06, %v256_v20  ;;  %v268_v23 = vmul.f32 3.8918573e-05, %v256_v20 }
  0xa3   : > { %v258_v25 = vadd.f32 0.00028619796, %v257_v22  ;;  %v269_v26 = vadd.f32 0.001143296, %v268_v23 }
  0xa5   : > { %v259_v28 = vmul.f32 %v258_v25, %v256_v20  ;;  %v270_v29 = vmul.f32 %v269_v26, %v256_v20 }
  0xa7   : > { %v271_v31 = vadd.f32 0.014752088, %v270_v29  ;;  %v260_v32 = vadd.f32 0.0036580483, %v259_v28 }
  0xa9   : > { %v272_v34 = vmul.f32 %v271_v31, %v256_v20  ;;  %v261_v37 = vmul.f32 %v260_v32, %v256_v20 }
  0xab   : > { %v273_v36 = vadd.f32 0.112945676, %v272_v34  ;;  %v262_v40 = vadd.f32 0.05243302, %v261_v37 }
  0xad   : > { %v274_v38 = vmul.f32 %v273_v36, %v256_v20  ;;  %v263_v43 = vmul.f32 %v262_v40, %v256_v20 }
  0xaf   : > { %v275_v39 = vadd.f32 0.4994258, %v274_v38  ;;  %v264_v44 = vadd.f32 0.18741608, %v263_v43 }
  0xb1   : > { %v276_v41 = vmul.f32 %v275_v39, %v256_v20  ;;  %v265_v46 = vmul.f32 %v264_v44, %v256_v20 }
  0xb3   : > { %v277_v42 = vadd.f32 1.0, %v276_v41  ;;  %v266_v50 = vadd.f32 1.1283791, %v265_v46 }
  0xb5   : > { %466 = vrcp.f32 %v277_v42  ;;  %v289_v49 = vand.u32 2147483648, %v277_v42  ;;  %v287_v52 = vand.u32 2147483647, %v277_v42  ;;  %vm283_vm2 = vweird.f32 %v277_v42 }
  0xb6   : > { %v267_v55 = vmul.f32 %v266_v50, %v254_v16 }
  0xb7   : > { %v290_v54 = vor.u32 1.1754944e-38, %v289_v49  ;;  %vm288_vm4 = vcmp.eq.f32.partialorder %v287_v52, 8.507059e+37 }
  0xbb   : > { %v467_v45 = vpop.eup %466 }
  0xbc   : > { %v279_v47 = vmul.f32 %v467_v45, %v277_v42  ;;  %vm284_vm1 = vweird.f32 %v467_v45 }
  0xbd   : > { %vm285_vm3 = vmor %vm283_vm2, %vm284_vm1 }
  0xbe   : > { %v280_v48 = vsub.f32 1.0, %v279_v47 }
  0xc0   : > { %v281_v51 = vmul.f32 %v467_v45, %v280_v48 }
  0xc2   : > { %v282_v53 = vadd.f32 %v467_v45, %v281_v51 }
  0xc4   : > { %v286_v56 = vsel %vm285_vm3, %v467_v45, %v282_v53 }
  0xc5   : > { %v291_v57 = vsel %vm288_vm4, %v290_v54, %v286_v56 }
  0xc6   : > { %v292_v58 = vmul.f32 %v291_v57, %v267_v55 }
  0xc8   : > { %v420_v59 = vclamps-f32 %v292_v58, 1.0 }
  0xca   : > { %v295_v61 = vadd.f32 1.0, %v420_v59 }
  0xcc   : > { %v296_v62 = vmul.f32 %v295_v61, %v253_v60 }
  0xce   : > { %333 = vmatmul.f32.vlgmr.msra.gmra.mxu1 %v296_v62 }
 0x14b   : > { %v334_v0 = vpop.f32.mrf.mxu1 }
 0x14c   : > { %v335_v1 = vadd.f32 %v465_v63, %v334_v0 }
 0x14e   : > { %337 = vst.msk [vmem:[%s215_s12] sm:$0xff] %vm229_vm0, %v335_v1 }
 0x14f   : > { %495 = shalt.err (!%p492_p3)
}
 0x150   : > { %425 = dma.vmem_to_hbm [thread:$0]  (%p600_p5), %s352_s13, 128, %s354_s14, %s339_s15  }
 0x151 PF: > { %p431_p4 = scmp.ge.s32.totalorder %s530_s21, 2  ;;  %s365_s26 = sand.u32 1, %s518_s18  }
 0x152   : > { %s366_s7 = scalar_lea.sflag [#allocation3], %s365_s26 }
 0x153   : > { %p428_p7 = pnand %p431_p4, %p604_p6 }
 0x155   : > { %p429_p8 = pneg %p428_p7 }
 0x157   : > { %513 = dma.done.wait (%p429_p8), %s366_s7, 128  }
 0x158   : > { %515 = vsyncadd (%p429_p8), %s366_s7, 4294967168  ;;  %p15_p9 = scmp.ge.s32.totalorder %s587_s24, 4   ;;  %s723_s18 = smov %s522_s19 }
 0x159   : > { %s724_s19 = smov %s526_s20  ;;  %s725_s20 = smov %s598_s27 }
 0x15a   : > { %s726_s21 = smov %s587_s24  ;;  %17 = sbr.rel (!%p15_p9) target bundleno = 3 (0x3), region = 75 }
 0x15f   :  { %372 = vsyncpa [#allocation3], 1 }
 0x160   :  { %374 = vsyncpa [#allocation3 + $0x1], 1 }

</bundles_post_ra>
